<compile_context>
chip_gen: v5e
topology: v5e:2x2
jax: 0.10.0
libtpu: 0.0.40
codegen_flags: <defaults>
</compile_context>

<pallas_src>
import jax
import jax.numpy as jnp
import numpy as np
from jax.experimental import pallas as pl
from jax.experimental.pallas import tpu as pltpu

# ----------------------------- model config -------------------------------
C = 4            # EEG electrodes (conv "height")
T = 32           # time samples (conv "width")
F1 = 4           # filter_1
D = 2            # depth multiplier
F1D = F1 * D
F2 = 8           # filter_2
K1 = 8           # c_kernel_1 = (1, 8), padding='same'
K3 = 4           # c_kernel_3 = (1, 4), padding='same'
P1 = 4           # p_kernel_1 = (1, 4)
P2 = 2           # p_kernel_2 = (1, 2)
NCLS = 4
EPS = 1e-5

PAD1_L = (K1 - 1) // 2          # torch 'same': left = total // 2  (=3)
PAD3_L = (K3 - 1) // 2          # (=1)
T2 = T // P1                    # time after first avg-pool  (=8)
T3 = T2 // P2                   # time after second avg-pool (=4)
NFLAT = F2 * T3                 # classifier input_neurons   (=32)

# ----------------------------- kernel layout -------------------------------
CT = C * T                      # 128  flattened input lanes  (c*T + t)
WIDE = 256                      # lane width of every padded slab (= F1D*T)
WA = F1D * T                    # 256  stage-A real width     (g*T + t)
WB = F2 * T2                    # 64   stage-B real width     (o*T2 + t2)
NEG = -1e9                      # pre-softmax filler for padded logit lanes

R_MA = 0                        # rows   0:128  stage-A matrix (CT, WIDE)
R_MB = R_MA + CT                # rows 128:384  stage-B matrix (WIDE, WIDE)
R_MC = R_MB + WIDE              # rows 384:640  stage-C matrix (WIDE, WIDE)
R_BA = R_MC + WIDE              # row 640       stage-A bias
R_BB = R_BA + 8                 # row 648       stage-B bias
R_BC = R_BB + 8                 # row 656       stage-C bias (logits, -1e9 pad)
SLAB_ROWS = R_BC + 8            # 664 rows (multiple of 8)

BATCH_TILE = 256                # samples per grid step (multiple of 8)


# ------------------------------ kernel ------------------------------------
def _elu(x):
    # torch.nn.ELU(alpha=1.0)
    return jnp.where(x > 0, x, jnp.exp(jnp.minimum(x, 0.0)) - 1.0)


def eegnet_kernel(x_ref, p_ref, out_ref):
    x = x_ref[...]                                               # (BT, 128)

    # temporal conv (1,K1) 'same' + BN1 + spatial depthwise conv (C,1) + BN2
    a = jnp.dot(x, p_ref[R_MA:R_MA + CT, :],
                preferred_element_type=jnp.float32) + p_ref[R_BA:R_BA + 1, :]
    a = _elu(a)                                                  # (BT, 256)

    # AvgPool(1,P1) + depthwise conv (1,K3) 'same' + pointwise 1x1 + BN3
    b = jnp.dot(a, p_ref[R_MB:R_MB + WIDE, :],
                preferred_element_type=jnp.float32) + p_ref[R_BB:R_BB + 1, :]
    b = _elu(b)                                                  # (BT, 256); real cols :64

    # AvgPool(1,P2) + Flatten (channel-major) + Linear
    logits = jnp.dot(b, p_ref[R_MC:R_MC + WIDE, :],
                     preferred_element_type=jnp.float32) + p_ref[R_BC:R_BC + 1, :]

    # LogSoftmax over lanes; padded lanes carry -1e9 -> exp() underflows to 0.
    m = jnp.max(logits, axis=-1, keepdims=True)
    lse = jnp.log(jnp.sum(jnp.exp(logits - m), axis=-1, keepdims=True)) + m
    out_ref[...] = logits - lse                                  # lane-dense store


# --------------------------- raw parameters --------------------------------
def make_params(key):
    ks = jax.random.split(key, 9)
    tw = 0.3 * jax.random.normal(ks[0], (F1, K1), jnp.float32)      # temporal conv (1,K1)
    sw = 0.3 * jax.random.normal(ks[1], (F1D, C), jnp.float32)      # spatial depthwise (C,1)
    dw = 0.3 * jax.random.normal(ks[2], (F1D, K3), jnp.float32)     # separable depthwise (1,K3)
    pw = 0.3 * jax.random.normal(ks[3], (F2, F1D), jnp.float32)     # pointwise 1x1
    wfc = 0.3 * jax.random.normal(ks[4], (NCLS, NFLAT), jnp.float32)
    bfc = 0.1 * jax.random.normal(ks[5], (NCLS,), jnp.float32)

    def bn(k, n):
        k1, k2, k3_, k4_ = jax.random.split(k, 4)
        gamma = 1.0 + 0.1 * jax.random.normal(k1, (n,), jnp.float32)
        beta = 0.1 * jax.random.normal(k2, (n,), jnp.float32)
        mean = 0.1 * jax.random.normal(k3_, (n,), jnp.float32)
        var = 1.0 + 0.2 * jax.random.uniform(k4_, (n,), jnp.float32)
        scale = gamma / jnp.sqrt(var + EPS)
        return scale, beta - mean * scale

    s1, h1 = bn(ks[6], F1)
    s2, h2 = bn(ks[7], F1D)
    s3, h3 = bn(ks[8], F2)
    return dict(tw=tw, sw=sw, dw=dw, pw=pw, wfc=wfc, bfc=bfc,
                s1=s1, h1=h1, s2=s2, h2=h2, s3=s3, h3=h3)


# --------------------- fold linear ops into the slab ------------------------
def _conv_matrix(w, n, pad_l):
    """Toeplitz matrix M[f, t_in, t_out] for 'same' cross-correlation w[f, :]."""
    k = w.shape[-1]
    diff = jnp.arange(n)[:, None] - jnp.arange(n)[None, :] + pad_l
    valid = (diff >= 0) & (diff < k)
    return jnp.where(valid[None], w[:, jnp.clip(diff, 0, k - 1)], 0.0)


def fold_params(p):
    """Fold convs / BN / pools / flatten / FC into 3 matmul stages, packed into
    one (8,128)-aligned parameter slab (single DMA)."""
    group = np.arange(F1D) // D                    # grouped-conv output-channel -> group

    # ---- stage A: temporal conv + BN1 + spatial depthwise conv + BN2 ----
    cm1 = _conv_matrix(p['tw'], T, PAD1_L)                        # (F1, T, T)
    coef = p['sw'] * (p['s2'] * p['s1'][group])[:, None]          # (F1D, C)
    ma = jnp.einsum('gc,gab->cagb', coef, cm1[group]).reshape(CT, WA)
    ba = p['s2'] * p['h1'][group] * p['sw'].sum(axis=1) + p['h2']
    ba = jnp.repeat(ba, T)                                        # (F1D*T,)

    # ---- stage B: AvgPool(1,P1) + depthwise (1,K3) + pointwise 1x1 + BN3 ----
    pool1 = (jnp.arange(T)[:, None] // P1 ==
             jnp.arange(T2)[None, :]).astype(jnp.float32) / P1    # (T, T2)
    cm3 = _conv_matrix(p['dw'], T2, PAD3_L)                       # (F1D, T2, T2)
    tg = jnp.einsum('ta,gab->gtb', pool1, cm3)                    # (F1D, T, T2)
    mb = jnp.einsum('og,gtb->gtob', p['pw'] * p['s3'][:, None], tg).reshape(WA, WB)
    bb = jnp.repeat(p['h3'], T2)                                  # (F2*T2,)

    # ---- stage C: AvgPool(1,P2) + Flatten (channel-major) + Linear ----
    pool2 = (jnp.arange(T2)[:, None] // P2 ==
             jnp.arange(T3)[None, :]).astype(jnp.float32) / P2    # (T2, T3)
    mc = jnp.einsum('ab,nob->oan', pool2,
                    p['wfc'].reshape(NCLS, F2, T3)).reshape(WB, NCLS)

    slab = jnp.zeros((SLAB_ROWS, WIDE), jnp.float32)
    slab = slab.at[R_MA:R_MA + CT, :WA].set(ma)
    slab = slab.at[R_MB:R_MB + WA, :WB].set(mb)
    slab = slab.at[R_MC:R_MC + WB, :NCLS].set(mc)
    slab = slab.at[R_BA, :WA].set(ba)
    slab = slab.at[R_BB, :WB].set(bb)
    slab = slab.at[R_BC, :].set(
        jnp.full((WIDE,), NEG, jnp.float32).at[:NCLS].set(p['bfc']))
    return slab


# ------------------------------ wrapper -------------------------------------
def _round_up(n, m):
    return ((n + m - 1) // m) * m


@jax.jit
def eegnet_forward(x, slab):
    """x: (B, 1, C, T) NCHW like torch; returns (B, NCLS) log-probabilities."""
    bn_ = x.shape[0]
    xf = x.reshape(bn_, CT)                         # (B, C*T): c-major, t-minor
    bt = min(BATCH_TILE, _round_up(bn_, 8))         # batch tile (multiple of 8)
    bp = _round_up(bn_, bt)
    if bp != bn_:
        xf = jnp.pad(xf, ((0, bp - bn_), (0, 0)))
    out = pl.pallas_call(
        eegnet_kernel,
        out_shape=jax.ShapeDtypeStruct((bp, WIDE), jnp.float32),
        grid=(bp // bt,),
        in_specs=[pl.BlockSpec((bt, CT), lambda i: (i, 0)),
                  pl.BlockSpec((SLAB_ROWS, WIDE), lambda i: (0, 0))],
        out_specs=pl.BlockSpec((bt, WIDE), lambda i: (i, 0)),
        compiler_params=pltpu.CompilerParams(
            dimension_semantics=("parallel",)),
    )(xf, slab)
    return out[:bn_, :NCLS]


# --------------------- direct (unfused) JAX reference -----------------------
def eegnet_reference(x, p):
    b = x.shape[0]
    xs = x[:, 0]                                                  # (B, C, T)
    xpad = jnp.pad(xs, ((0, 0), (0, 0), (PAD1_L, K1 - 1 - PAD1_L)))
    y = jnp.zeros((b, F1, C, T), jnp.float32)
    for j in range(K1):
        y = y + p['tw'][:, j][None, :, None, None] * xpad[:, None, :, j:j + T]
    y = y * p['s1'][None, :, None, None] + p['h1'][None, :, None, None]

    group = np.arange(F1D) // D
    z = jnp.stack([jnp.einsum('c,bct->bt', p['sw'][g], y[:, group[g]])
                   for g in range(F1D)], axis=1)                  # (B, F1D, T)
    z = z * p['s2'][None, :, None] + p['h2'][None, :, None]
    z = jax.nn.elu(z)
    z = z.reshape(b, F1D, T2, P1).mean(-1)                        # AvgPool (1,P1)

    zpad = jnp.pad(z, ((0, 0), (0, 0), (PAD3_L, K3 - 1 - PAD3_L)))
    u = jnp.zeros((b, F1D, T2), jnp.float32)
    for j in range(K3):
        u = u + p['dw'][:, j][None, :, None] * zpad[:, :, j:j + T2]
    v = jnp.einsum('og,bgt->bot', p['pw'], u)
    v = v * p['s3'][None, :, None] + p['h3'][None, :, None]
    v = jax.nn.elu(v)
    v = v.reshape(b, F2, T3, P2).mean(-1)                         # AvgPool (1,P2)

    flat = v.reshape(b, F2 * T3)                                  # channel-major flatten
    logits = flat @ p['wfc'].T + p['bfc']
    return jax.nn.log_softmax(logits, axis=-1)


if __name__ == "__main__":
    key = jax.random.PRNGKey(0)
    kx, kp = jax.random.split(key)
    params = make_params(kp)
    slab = fold_params(params)

    B = 2
    x = jax.random.normal(kx, (B, 1, C, T), jnp.float32)

    out = jax.block_until_ready(eegnet_forward(x, slab))
    ref = jax.block_until_ready(eegnet_reference(x, params))

    assert out.shape == (B, NCLS)
    assert bool(jnp.all(jnp.isfinite(out)))
    # log-softmax rows must exp-sum to 1
    assert bool(jnp.allclose(jnp.sum(jnp.exp(out), axis=-1), 1.0, atol=1e-4))
    # folded-matmul kernel vs direct reference (TPU default matmul precision)
    assert bool(jnp.allclose(out, ref, atol=2e-2, rtol=2e-2)), \
        float(jnp.max(jnp.abs(out - ref)))
    print("KERNEL_OK")
</pallas_src>

<mosaic_0001>
module attributes {stable_mosaic.version = 11 : i64} {
  func.func @eegnet_kernel(%arg0: i32, %arg1: memref<8x128xf32, #tpu.memory_space<vmem>>, %arg2: memref<664x256xf32, #tpu.memory_space<vmem>>, %arg3: memref<8x256xf32, #tpu.memory_space<vmem>>) attributes {dimension_semantics = [#tpu.dimension_semantics<parallel>], iteration_bounds = array<i64: 1>, scalar_prefetch = 0 : i64, scratch_operands = 0 : i64, tpu.core_type = #tpu.core_type<tc>, window_params = [{transform_indices = @transform_0, window_bounds = array<i64: 8, 128>}, {pipeline_mode = #tpu.pipeline_mode<synchronous>, transform_indices = @transform_1, window_bounds = array<i64: 664, 256>}, {transform_indices = @transform_2, window_bounds = array<i64: 8, 256>}]} {
    %c0 = arith.constant 0 : index
    %c0_0 = arith.constant 0 : index
    %0 = vector.load %arg1[%c0, %c0_0] : memref<8x128xf32, #tpu.memory_space<vmem>>, vector<8x128xf32>
    %c0_1 = arith.constant 0 : index
    %c0_2 = arith.constant 0 : index
    %1 = vector.load %arg2[%c0_1, %c0_2] : memref<664x256xf32, #tpu.memory_space<vmem>>, vector<128x256xf32>
    %cst = arith.constant dense<0.000000e+00> : vector<8x256xf32>
    %2 = tpu.matmul %0, %1, %cst {dimension_numbers = #tpu.dot_dimension_numbers<[1], [0], [0], [1], [0, 0, 1, 1], [], []>} : vector<8x128xf32>, vector<128x256xf32>, vector<8x256xf32> -> vector<8x256xf32>
    %c640 = arith.constant 640 : index
    %c0_3 = arith.constant 0 : index
    %3 = vector.load %arg2[%c640, %c0_3] : memref<664x256xf32, #tpu.memory_space<vmem>>, vector<1x256xf32>
    %4 = vector.broadcast %3 : vector<1x256xf32> to vector<8x256xf32>
    %5 = arith.addf %2, %4 : vector<8x256xf32>
    %cst_4 = arith.constant 0.000000e+00 : f32
    %6 = vector.broadcast %cst_4 : f32 to vector<8x256xf32>
    %7 = arith.cmpf ogt, %5, %6 : vector<8x256xf32>
    %cst_5 = arith.constant 0.000000e+00 : f32
    %8 = vector.broadcast %cst_5 : f32 to vector<8x256xf32>
    %9 = arith.minimumf %5, %8 : vector<8x256xf32>
    %10 = math.exp %9 : vector<8x256xf32>
    %cst_6 = arith.constant 1.000000e+00 : f32
    %11 = vector.broadcast %cst_6 : f32 to vector<8x256xf32>
    %12 = arith.subf %10, %11 : vector<8x256xf32>
    %13 = arith.select %7, %5, %12 : vector<8x256xi1>, vector<8x256xf32>
    %c128 = arith.constant 128 : index
    %c0_7 = arith.constant 0 : index
    %14 = vector.load %arg2[%c128, %c0_7] : memref<664x256xf32, #tpu.memory_space<vmem>>, vector<256x256xf32>
    %cst_8 = arith.constant dense<0.000000e+00> : vector<8x256xf32>
    %15 = tpu.matmul %13, %14, %cst_8 {dimension_numbers = #tpu.dot_dimension_numbers<[1], [0], [0], [1], [0, 0, 1, 1], [], []>} : vector<8x256xf32>, vector<256x256xf32>, vector<8x256xf32> -> vector<8x256xf32>
    %c648 = arith.constant 648 : index
    %c0_9 = arith.constant 0 : index
    %16 = vector.load %arg2[%c648, %c0_9] : memref<664x256xf32, #tpu.memory_space<vmem>>, vector<1x256xf32>
    %17 = vector.broadcast %16 : vector<1x256xf32> to vector<8x256xf32>
    %18 = arith.addf %15, %17 : vector<8x256xf32>
    %cst_10 = arith.constant 0.000000e+00 : f32
    %19 = vector.broadcast %cst_10 : f32 to vector<8x256xf32>
    %20 = arith.cmpf ogt, %18, %19 : vector<8x256xf32>
    %cst_11 = arith.constant 0.000000e+00 : f32
    %21 = vector.broadcast %cst_11 : f32 to vector<8x256xf32>
    %22 = arith.minimumf %18, %21 : vector<8x256xf32>
    %23 = math.exp %22 : vector<8x256xf32>
    %cst_12 = arith.constant 1.000000e+00 : f32
    %24 = vector.broadcast %cst_12 : f32 to vector<8x256xf32>
    %25 = arith.subf %23, %24 : vector<8x256xf32>
    %26 = arith.select %20, %18, %25 : vector<8x256xi1>, vector<8x256xf32>
    %c384 = arith.constant 384 : index
    %c0_13 = arith.constant 0 : index
    %27 = vector.load %arg2[%c384, %c0_13] : memref<664x256xf32, #tpu.memory_space<vmem>>, vector<256x256xf32>
    %cst_14 = arith.constant dense<0.000000e+00> : vector<8x256xf32>
    %28 = tpu.matmul %26, %27, %cst_14 {dimension_numbers = #tpu.dot_dimension_numbers<[1], [0], [0], [1], [0, 0, 1, 1], [], []>} : vector<8x256xf32>, vector<256x256xf32>, vector<8x256xf32> -> vector<8x256xf32>
    %c656 = arith.constant 656 : index
    %c0_15 = arith.constant 0 : index
    %29 = vector.load %arg2[%c656, %c0_15] : memref<664x256xf32, #tpu.memory_space<vmem>>, vector<1x256xf32>
    %30 = vector.broadcast %29 : vector<1x256xf32> to vector<8x256xf32>
    %31 = arith.addf %28, %30 : vector<8x256xf32>
    %cst_16 = arith.constant dense<0xFF800000> : vector<8xf32>
    %32 = vector.multi_reduction <maximumf>, %31, %cst_16 [1] : vector<8x256xf32> to vector<8xf32>
    %33 = vector.shape_cast %32 : vector<8xf32> to vector<8x1xf32>
    %34 = vector.broadcast %33 : vector<8x1xf32> to vector<8x256xf32>
    %35 = arith.subf %31, %34 : vector<8x256xf32>
    %36 = math.exp %35 : vector<8x256xf32>
    %cst_17 = arith.constant dense<0.000000e+00> : vector<8xf32>
    %37 = vector.multi_reduction <add>, %36, %cst_17 [1] : vector<8x256xf32> to vector<8xf32>
    %38 = vector.shape_cast %37 : vector<8xf32> to vector<8x1xf32>
    %39 = math.log %38 : vector<8x1xf32>
    %40 = arith.addf %39, %33 : vector<8x1xf32>
    %41 = vector.broadcast %40 : vector<8x1xf32> to vector<8x256xf32>
    %42 = arith.subf %31, %41 : vector<8x256xf32>
    %c0_18 = arith.constant 0 : index
    %c0_19 = arith.constant 0 : index
    %43 = vector.load %arg3[%c0_18, %c0_19] : memref<8x256xf32, #tpu.memory_space<vmem>>, vector<8x256xf32>
    tpu.vector_store %arg3[%c0_18, %c0_19], %42 {strides = array<i32>} : memref<8x256xf32, #tpu.memory_space<vmem>>, vector<8x256xf32>,
    return
  }
  func.func @transform_0(%arg0: i32) -> (i32, i32) {
    %c0_i32 = arith.constant 0 : i32
    %c0_i32_0 = arith.constant 0 : i32
    return %arg0, %c0_i32 : i32, i32
  }
  func.func @transform_1(%arg0: i32) -> (i32, i32) {
    %c0_i32 = arith.constant 0 : i32
    %c0_i32_0 = arith.constant 0 : i32
    %c0_i32_1 = arith.constant 0 : i32
    return %c0_i32, %c0_i32_0 : i32, i32
  }
  func.func @transform_2(%arg0: i32) -> (i32, i32) {
    %c0_i32 = arith.constant 0 : i32
    %c0_i32_0 = arith.constant 0 : i32
    return %arg0, %c0_i32 : i32, i32
  }
}

</mosaic_0001>

<bundles_post_ra>
// kernel: eegnet_forward.1
= control target key start
LH: loop header
LB: loop body
LE: loop exit
PB: predicated region body
PF: predicated region fallthrough
CT: control target
= control target key end

     0   :  { %7 = vsyncpa [#allocation3], 0  ;;  %s504_s12 = smov [#allocation2]   ;;  %s505_s14 = smov 256   ;;  %s534_s0 = inlined_call_operand.vmem [shape: f32[8,128], index: 0, kind: input, shape index: {}]   ;;  %s535_s1 = inlined_call_operand.hbm [shape: f32[664,256], index: 1, kind: input, shape index: {}]   ;;  %s536_s2 = inlined_call_operand.vmem [shape: f32[8,256], index: 2, kind: output, shape index: {}]  }
   0x1   :  { %s14_s11 = sshll.u32 %s535_s1, 4  ;;  %s16_s13 = sshll.u32 %s504_s12, 4  ;;  %s15_s11 = int_to_ptr.hbm [resolvable:$true] %s14_s11  ;;  %s17_s13 = int_to_ptr.vmem [resolvable:$true] %s16_s13 }
   0x2   :  { %s506_s15 = smov 16  }
   0x3   :  { %22 = dma.hbm_to_vmem [thread:$0]  %s15_s11, 21248, %s17_s13, [#allocation3], %s505_s14, %s505_s14, %s506_s15  }
   0x4   :  { %502 = dma.done.wait [#allocation3], 21248  }
   0x5   :  { %503 = vsyncadd [#allocation3], 4294946048  ;;  %v58_v0 = vld [vmem:[#allocation2 + $0xf0] sm:$0xff]  ;;  %v59_v1 = vld [vmem:[#allocation2 + $0xf8] sm:$0xff] }
   0x6   :  { %v56_v2 = vld [vmem:[#allocation2 + $0xe0] sm:$0xff]  ;;  %67 = vmatpush.msra.mxu0 %v58_v0  ;;  %87 = vmatpush.msra.mxu1 %v59_v1  ;;  %v57_v3 = vld [vmem:[#allocation2 + $0xe8] sm:$0xff]  ;;  %v54_v4 = vld [vmem:[#allocation2 + $0xd0] sm:$0xff] }
   0x7   :  { %v55_v5 = vld [vmem:[#allocation2 + $0xd8] sm:$0xff]  ;;  %v52_v6 = vld [vmem:[#allocation2 + $0xc0] sm:$0xff]  ;;  %v53_v7 = vld [vmem:[#allocation2 + $0xc8] sm:$0xff] }
   0x8   :  { %68 = vmatpush.msra.mxu0 %v56_v2  ;;  %88 = vmatpush.msra.mxu1 %v57_v3  ;;  %v50_v8 = vld [vmem:[#allocation2 + $0xb0] sm:$0xff]  ;;  %v51_v9 = vld [vmem:[#allocation2 + $0xb8] sm:$0xff]  ;;  %v48_v10 = vld [vmem:[#allocation2 + $0xa0] sm:$0xff] }
   0x9   :  { %v49_v11 = vld [vmem:[#allocation2 + $0xa8] sm:$0xff]  ;;  %v46_v12 = vld [vmem:[#allocation2 + $0x90] sm:$0xff]  ;;  %v47_v13 = vld [vmem:[#allocation2 + $0x98] sm:$0xff] }
   0xa   :  { %69 = vmatpush.msra.mxu0 %v54_v4  ;;  %89 = vmatpush.msra.mxu1 %v55_v5  ;;  %v44_v14 = vld [vmem:[#allocation2 + $0x80] sm:$0xff]  ;;  %v149_v15 = vld [vmem:[#allocation2 + $0x1f0] sm:$0xff]  ;;  %v45_v17 = vld [vmem:[#allocation2 + $0x88] sm:$0xff] }
   0xb   :  { %v181_v16 = vld [vmem:[#allocation2 + $0x2f0] sm:$0xff]  ;;  %190 = vmatpush.msra.mxu2 %v149_v15  ;;  %v147_v18 = vld [vmem:[#allocation2 + $0x1e0] sm:$0xff]  ;;  %v43_v22 = vld [vmem:[#allocation2 + $0x78] sm:$0xff] }
   0xc   :  { %70 = vmatpush.msra.mxu0 %v52_v6  ;;  %90 = vmatpush.msra.mxu1 %v53_v7  ;;  %v179_v19 = vld [vmem:[#allocation2 + $0x2e0] sm:$0xff]  ;;  %v145_v20 = vld [vmem:[#allocation2 + $0x1d0] sm:$0xff]  ;;  %v41_v27 = vld [vmem:[#allocation2 + $0x68] sm:$0xff] }
   0xd   :  { %210 = vmatpush.msra.mxu3 %v181_v16  ;;  %v42_v21 = vld [vmem:[#allocation2 + $0x70] sm:$0xff]  ;;  %191 = vmatpush.msra.mxu2 %v147_v18  ;;  %v143_v24 = vld [vmem:[#allocation2 + $0x1c0] sm:$0xff]  ;;  %v39_v31 = vld [vmem:[#allocation2 + $0x58] sm:$0xff] }
   0xe   :  { %71 = vmatpush.msra.mxu0 %v50_v8  ;;  %91 = vmatpush.msra.mxu1 %v51_v9  ;;  %v177_v23 = vld [vmem:[#allocation2 + $0x2d0] sm:$0xff]  ;;  %v175_v25 = vld [vmem:[#allocation2 + $0x2c0] sm:$0xff]  ;;  %v37_v35 = vld [vmem:[#allocation2 + $0x48] sm:$0xff] }
   0xf   :  { %211 = vmatpush.msra.mxu3 %v179_v19  ;;  %v40_v26 = vld [vmem:[#allocation2 + $0x60] sm:$0xff]  ;;  %192 = vmatpush.msra.mxu2 %v145_v20  ;;  %v141_v28 = vld [vmem:[#allocation2 + $0x1b0] sm:$0xff]  ;;  %v35_v39 = vld [vmem:[#allocation2 + $0x38] sm:$0xff] }
  0x10   :  { %72 = vmatpush.msra.mxu0 %v48_v10  ;;  %92 = vmatpush.msra.mxu1 %v49_v11  ;;  %v173_v29 = vld [vmem:[#allocation2 + $0x2b0] sm:$0xff]  ;;  %v139_v32 = vld [vmem:[#allocation2 + $0x1a0] sm:$0xff]  ;;  %v33_v41 = vld [vmem:[#allocation2 + $0x28] sm:$0xff] }
  0x11   :  { %212 = vmatpush.msra.mxu3 %v177_v23  ;;  %v38_v30 = vld [vmem:[#allocation2 + $0x50] sm:$0xff]  ;;  %193 = vmatpush.msra.mxu2 %v143_v24  ;;  %v171_v33 = vld [vmem:[#allocation2 + $0x2a0] sm:$0xff]  ;;  %v31_v43 = vld [vmem:[#allocation2 + $0x18] sm:$0xff] }
  0x12   :  { %73 = vmatpush.msra.mxu0 %v46_v12  ;;  %93 = vmatpush.msra.mxu1 %v47_v13  ;;  %v36_v34 = vld [vmem:[#allocation2 + $0x40] sm:$0xff]  ;;  %v137_v36 = vld [vmem:[#allocation2 + $0x190] sm:$0xff]  ;;  %v29_v45 = vld [vmem:[#allocation2 + $0x8] sm:$0xff] }
  0x13   :  { %213 = vmatpush.msra.mxu3 %v175_v25  ;;  %194 = vmatpush.msra.mxu2 %v141_v28  ;;  %v169_v37 = vld [vmem:[#allocation2 + $0x290] sm:$0xff]  ;;  %v32_v40 = vld [vmem:[#allocation2 + $0x20] sm:$0xff]  ;;  %v150_v47 = vld [vmem:[#allocation2 + $0x1f8] sm:$0xff] }
  0x14   :  { %74 = vmatpush.msra.mxu0 %v44_v14  ;;  %94 = vmatpush.msra.mxu1 %v45_v17  ;;  %v34_v38 = vld [vmem:[#allocation2 + $0x30] sm:$0xff]  ;;  %v28_v44 = vld [vmem:[#allocation2] sm:$0xff]  ;;  %v182_v48 = vld [vmem:[#allocation2 + $0x2f8] sm:$0xff] }
  0x15   :  { %214 = vmatpush.msra.mxu3 %v173_v29  ;;  %195 = vmatpush.msra.mxu2 %v139_v32  ;;  %v30_v42 = vld [vmem:[#allocation2 + $0x10] sm:$0xff]  ;;  %v27_v46 = vld [vmem:[%s534_s0] sm:$0xff]  ;;  %v148_v49 = vld [vmem:[#allocation2 + $0x1e8] sm:$0xff] }
  0x16   :  { %75 = vmatpush.msra.mxu0 %v42_v21  ;;  %95 = vmatpush.msra.mxu1 %v43_v22  ;;  %v180_v50 = vld [vmem:[#allocation2 + $0x2e8] sm:$0xff]  ;;  %v146_v51 = vld [vmem:[#allocation2 + $0x1d8] sm:$0xff]  ;;  %v135_v61 = vld [vmem:[#allocation2 + $0x180] sm:$0xff] }
  0x17   :  { %215 = vmatpush.msra.mxu3 %v171_v33  ;;  %196 = vmatpush.msra.mxu2 %v137_v36  ;;  %v178_v52 = vld [vmem:[#allocation2 + $0x2d8] sm:$0xff]  ;;  %v144_v53 = vld [vmem:[#allocation2 + $0x1c8] sm:$0xff]  ;;  %v167_v62 = vld [vmem:[#allocation2 + $0x280] sm:$0xff] }
  0x18   :  { %76 = vmatpush.msra.mxu0 %v40_v26  ;;  %96 = vmatpush.msra.mxu1 %v41_v27  ;;  %v176_v54 = vld [vmem:[#allocation2 + $0x2c8] sm:$0xff]  ;;  %v142_v55 = vld [vmem:[#allocation2 + $0x1b8] sm:$0xff]  ;;  %v133_v1 = vld [vmem:[#allocation2 + $0x170] sm:$0xff] }
  0x19   :  { %216 = vmatpush.msra.mxu3 %v169_v37  ;;  %v174_v56 = vld [vmem:[#allocation2 + $0x2b8] sm:$0xff]  ;;  %v140_v57 = vld [vmem:[#allocation2 + $0x1a8] sm:$0xff]  ;;  %197 = vmatpush.msra.mxu2 %v135_v61  ;;  %v165_v2 = vld [vmem:[#allocation2 + $0x270] sm:$0xff] }
  0x1a   :  { %77 = vmatpush.msra.mxu0 %v38_v30  ;;  %97 = vmatpush.msra.mxu1 %v39_v31  ;;  %v172_v58 = vld [vmem:[#allocation2 + $0x2a8] sm:$0xff]  ;;  %v138_v59 = vld [vmem:[#allocation2 + $0x198] sm:$0xff]  ;;  %v131_v5 = vld [vmem:[#allocation2 + $0x160] sm:$0xff] }
  0x1b   :  { %v170_v60 = vld [vmem:[#allocation2 + $0x298] sm:$0xff]  ;;  %v136_v63 = vld [vmem:[#allocation2 + $0x188] sm:$0xff]  ;;  %217 = vmatpush.msra.mxu3 %v167_v62  ;;  %198 = vmatpush.msra.mxu2 %v133_v1  ;;  %v163_v6 = vld [vmem:[#allocation2 + $0x260] sm:$0xff] }
  0x1c   :  { %78 = vmatpush.msra.mxu0 %v36_v34  ;;  %98 = vmatpush.msra.mxu1 %v37_v35  ;;  %v168_v0 = vld [vmem:[#allocation2 + $0x288] sm:$0xff]  ;;  %v134_v3 = vld [vmem:[#allocation2 + $0x178] sm:$0xff]  ;;  %v129_v9 = vld [vmem:[#allocation2 + $0x150] sm:$0xff] }
  0x1d   :  { %218 = vmatpush.msra.mxu3 %v165_v2  ;;  %v166_v4 = vld [vmem:[#allocation2 + $0x278] sm:$0xff]  ;;  %v132_v7 = vld [vmem:[#allocation2 + $0x168] sm:$0xff]  ;;  %199 = vmatpush.msra.mxu2 %v131_v5  ;;  %v161_v10 = vld [vmem:[#allocation2 + $0x250] sm:$0xff] }
  0x1e   :  { %79 = vmatpush.msra.mxu0 %v34_v38  ;;  %99 = vmatpush.msra.mxu1 %v35_v39  ;;  %v164_v8 = vld [vmem:[#allocation2 + $0x268] sm:$0xff]  ;;  %v130_v11 = vld [vmem:[#allocation2 + $0x158] sm:$0xff]  ;;  %v127_v13 = vld [vmem:[#allocation2 + $0x140] sm:$0xff] }
  0x1f   :  { %219 = vmatpush.msra.mxu3 %v163_v6  ;;  %200 = vmatpush.msra.mxu2 %v129_v9  ;;  %v162_v12 = vld [vmem:[#allocation2 + $0x258] sm:$0xff]  ;;  %v159_v14 = vld [vmem:[#allocation2 + $0x240] sm:$0xff]  ;;  %v128_v15 = vld [vmem:[#allocation2 + $0x148] sm:$0xff] }
  0x20   :  { %80 = vmatpush.msra.mxu0 %v32_v40  ;;  %100 = vmatpush.msra.mxu1 %v33_v41  ;;  %v160_v16 = vld [vmem:[#allocation2 + $0x248] sm:$0xff]  ;;  %v125_v17 = vld [vmem:[#allocation2 + $0x130] sm:$0xff]  ;;  %v126_v19 = vld [vmem:[#allocation2 + $0x138] sm:$0xff] }
  0x21   :  { %220 = vmatpush.msra.mxu3 %v161_v10  ;;  %201 = vmatpush.msra.mxu2 %v127_v13  ;;  %v157_v18 = vld [vmem:[#allocation2 + $0x230] sm:$0xff]  ;;  %v158_v20 = vld [vmem:[#allocation2 + $0x238] sm:$0xff]  ;;  %v123_v21 = vld [vmem:[#allocation2 + $0x120] sm:$0xff] }
  0x22   :  { %81 = vmatpush.msra.mxu0 %v30_v42  ;;  %101 = vmatpush.msra.mxu1 %v31_v43  ;;  %v155_v22 = vld [vmem:[#allocation2 + $0x220] sm:$0xff]  ;;  %v124_v23 = vld [vmem:[#allocation2 + $0x128] sm:$0xff]  ;;  %v121_v25 = vld [vmem:[#allocation2 + $0x110] sm:$0xff] }
  0x23   :  { %221 = vmatpush.msra.mxu3 %v159_v14  ;;  %202 = vmatpush.msra.mxu2 %v125_v17  ;;  %v156_v24 = vld [vmem:[#allocation2 + $0x228] sm:$0xff]  ;;  %v153_v26 = vld [vmem:[#allocation2 + $0x210] sm:$0xff]  ;;  %v122_v27 = vld [vmem:[#allocation2 + $0x118] sm:$0xff] }
  0x24   :  { %82 = vmatpush.msra.mxu0 %v28_v44  ;;  %102 = vmatpush.msra.mxu1 %v29_v45  ;;  %v154_v28 = vld [vmem:[#allocation2 + $0x218] sm:$0xff]  ;;  %v119_v29 = vld [vmem:[#allocation2 + $0x100] sm:$0xff]  ;;  %v120_v31 = vld [vmem:[#allocation2 + $0x108] sm:$0xff] }
  0x25   :  { %83 = vmatmul.f32.vlgmr.msra.gmra.mxu0 %v27_v46  ;;  %103 = vmatmul.f32.vlgmr.msra.gmra.mxu1 %v27_v46  ;;  %v151_v30 = vld [vmem:[#allocation2 + $0x200] sm:$0xff]  ;;  %v152_v32 = vld [vmem:[#allocation2 + $0x208] sm:$0xff]  ;;  %v344_v33 = vld [vmem:[#allocation2 + $0x4f0] sm:$0xff] }
  0x26   :  { %230 = vmatpush.msrb.mxu0 %v150_v47  ;;  %250 = vmatpush.msrb.mxu1 %v182_v48  ;;  %v345_v34 = vld [vmem:[#allocation2 + $0x4f8] sm:$0xff]  ;;  %v342_v35 = vld [vmem:[#allocation2 + $0x4e0] sm:$0xff]  ;;  %v343_v36 = vld [vmem:[#allocation2 + $0x4e8] sm:$0xff] }
  0x27   :  { %222 = vmatpush.msra.mxu3 %v157_v18  ;;  %203 = vmatpush.msra.mxu2 %v123_v21  ;;  %v340_v37 = vld [vmem:[#allocation2 + $0x4d0] sm:$0xff]  ;;  %v341_v38 = vld [vmem:[#allocation2 + $0x4d8] sm:$0xff]  ;;  %v310_v41 = vld [vmem:[#allocation2 + $0x3e0] sm:$0xff] }
  0x28   :  { %231 = vmatpush.msrb.mxu0 %v148_v49  ;;  %251 = vmatpush.msrb.mxu1 %v180_v50  ;;  %v312_v39 = vld [vmem:[#allocation2 + $0x3f0] sm:$0xff]  ;;  %v313_v40 = vld [vmem:[#allocation2 + $0x3f8] sm:$0xff]  ;;  %v338_v42 = vld [vmem:[#allocation2 + $0x4c0] sm:$0xff] }
  0x29   :  { %223 = vmatpush.msra.mxu3 %v155_v22  ;;  %204 = vmatpush.msra.mxu2 %v121_v25  ;;  %v339_v43 = vld [vmem:[#allocation2 + $0x4c8] sm:$0xff]  ;;  %v308_v45 = vld [vmem:[#allocation2 + $0x3d0] sm:$0xff]  ;;  %v309_v46 = vld [vmem:[#allocation2 + $0x3d8] sm:$0xff] }
  0x2a   :  { %232 = vmatpush.msrb.mxu0 %v146_v51  ;;  %252 = vmatpush.msrb.mxu1 %v178_v52  ;;  %v311_v44 = vld [vmem:[#allocation2 + $0x3e8] sm:$0xff]  ;;  %v336_v47 = vld [vmem:[#allocation2 + $0x4b0] sm:$0xff]  ;;  %v337_v48 = vld [vmem:[#allocation2 + $0x4b8] sm:$0xff] }
  0x2b   :  { %224 = vmatpush.msra.mxu3 %v153_v26  ;;  %205 = vmatpush.msra.mxu2 %v119_v29  ;;  %v61_v49 = vld [vmem:[#allocation2 + $0x500] ss:$8 sm:$0x3]  ;;  %v332_v5 = vld [vmem:[#allocation2 + $0x490] sm:$0xff]  ;;  %v305_v10 = vld [vmem:[#allocation2 + $0x3b8] sm:$0xff] }
  0x2c   :  { %233 = vmatpush.msrb.mxu0 %v144_v53  ;;  %253 = vmatpush.msrb.mxu1 %v176_v54  ;;  %v334_v50 = vld [vmem:[#allocation2 + $0x4a0] sm:$0xff]  ;;  %v335_v51 = vld [vmem:[#allocation2 + $0x4a8] sm:$0xff]  ;;  %v63_v52 = vperm.slane %v61_v49, 0  ;;  %v64_v53 = vperm.slane %v61_v49, 1  ;;  %v328_v13 = vld [vmem:[#allocation2 + $0x470] sm:$0xff] }
  0x2d   :  { %225 = vmatpush.msra.mxu3 %v151_v30  ;;  %353 = vmatpush.msrb.mxu2 %v312_v39  ;;  %v307_v6 = vld [vmem:[#allocation2 + $0x3c8] sm:$0xff]  ;;  %v330_v9 = vld [vmem:[#allocation2 + $0x480] sm:$0xff]  ;;  %v301_v18 = vld [vmem:[#allocation2 + $0x398] sm:$0xff] }
  0x2e   :  { %234 = vmatpush.msrb.mxu0 %v142_v55  ;;  %254 = vmatpush.msrb.mxu1 %v174_v56  ;;  %v303_v14 = vld [vmem:[#allocation2 + $0x3a8] sm:$0xff]  ;;  %v326_v17 = vld [vmem:[#allocation2 + $0x460] sm:$0xff]  ;;  %v324_v21 = vld [vmem:[#allocation2 + $0x450] sm:$0xff] }
  0x2f   :  { %373 = vmatpush.msrb.mxu3 %v344_v33  ;;  %354 = vmatpush.msrb.mxu2 %v310_v41  ;;  %v299_v22 = vld [vmem:[#allocation2 + $0x388] sm:$0xff]  ;;  %v322_v25 = vld [vmem:[#allocation2 + $0x440] sm:$0xff]  ;;  %v297_v26 = vld [vmem:[#allocation2 + $0x378] sm:$0xff] }
  0x30   :  { %235 = vmatpush.msrb.mxu0 %v140_v57  ;;  %255 = vmatpush.msrb.mxu1 %v172_v58  ;;  %v320_v29 = vld [vmem:[#allocation2 + $0x430] sm:$0xff]  ;;  %v295_v30 = vld [vmem:[#allocation2 + $0x368] sm:$0xff]  ;;  %v318_v33 = vld [vmem:[#allocation2 + $0x420] sm:$0xff] }
  0x31   :  { %374 = vmatpush.msrb.mxu3 %v342_v35  ;;  %355 = vmatpush.msrb.mxu2 %v308_v45  ;;  %v319_v35 = vld [vmem:[#allocation2 + $0x428] sm:$0xff]  ;;  %v317_v39 = vld [vmem:[#allocation2 + $0x418] sm:$0xff]  ;;  %v314_v41 = vld [vmem:[#allocation2 + $0x400] sm:$0xff] }
  0x32   :  { %236 = vmatpush.msrb.mxu0 %v138_v59  ;;  %256 = vmatpush.msrb.mxu1 %v170_v60  ;;  %v287_v45 = vld [vmem:[#allocation2 + $0x328] sm:$0xff] }
  0x33   :  { %375 = vmatpush.msrb.mxu3 %v340_v37  ;;  %v316_v37 = vld [vmem:[#allocation2 + $0x410] sm:$0xff]  ;;  %v283_v49 = vld [vmem:[#allocation2 + $0x308] sm:$0xff] }
  0x34   :  { %237 = vmatpush.msrb.mxu0 %v136_v63  ;;  %257 = vmatpush.msrb.mxu1 %v168_v0 }
  0x35   :  { %376 = vmatpush.msrb.mxu3 %v338_v42  ;;  %v289_v42 = vld [vmem:[#allocation2 + $0x338] sm:$0xff] }
  0x36   :  { %238 = vmatpush.msrb.mxu0 %v134_v3  ;;  %258 = vmatpush.msrb.mxu1 %v166_v4  ;;  %v306_v4 = vld [vmem:[#allocation2 + $0x3c0] sm:$0xff] }
  0x37   :  { %377 = vmatpush.msrb.mxu3 %v336_v47  ;;  %356 = vmatpush.msrb.mxu2 %v306_v4  ;;  %v285_v47 = vld [vmem:[#allocation2 + $0x318] sm:$0xff] }
  0x38   :  { %239 = vmatpush.msrb.mxu0 %v132_v7  ;;  %259 = vmatpush.msrb.mxu1 %v164_v8  ;;  %v333_v7 = vld [vmem:[#allocation2 + $0x498] sm:$0xff]  ;;  %v304_v8 = vld [vmem:[#allocation2 + $0x3b0] sm:$0xff] }
  0x39   :  { %378 = vmatpush.msrb.mxu3 %v334_v50  ;;  %357 = vmatpush.msrb.mxu2 %v304_v8  ;;  %v184_v50 = vld [vmem:[#allocation2 + $0x510] ss:$8 sm:$0x3] }
  0x3a   :  { %240 = vmatpush.msrb.mxu0 %v130_v11  ;;  %260 = vmatpush.msrb.mxu1 %v162_v12  ;;  %v331_v11 = vld [vmem:[#allocation2 + $0x488] sm:$0xff]  ;;  %v302_v12 = vld [vmem:[#allocation2 + $0x3a0] sm:$0xff] }
  0x3b   :  { %379 = vmatpush.msrb.mxu3 %v332_v5  ;;  %358 = vmatpush.msrb.mxu2 %v302_v12 }
  0x3c   :  { %241 = vmatpush.msrb.mxu0 %v128_v15  ;;  %261 = vmatpush.msrb.mxu1 %v160_v16  ;;  %v329_v15 = vld [vmem:[#allocation2 + $0x478] sm:$0xff]  ;;  %v300_v16 = vld [vmem:[#allocation2 + $0x390] sm:$0xff] }
  0x3d   :  { %380 = vmatpush.msrb.mxu3 %v330_v9  ;;  %359 = vmatpush.msrb.mxu2 %v300_v16 }
  0x3e   :  { %242 = vmatpush.msrb.mxu0 %v126_v19  ;;  %262 = vmatpush.msrb.mxu1 %v158_v20  ;;  %v327_v19 = vld [vmem:[#allocation2 + $0x468] sm:$0xff]  ;;  %v298_v20 = vld [vmem:[#allocation2 + $0x380] sm:$0xff] }
  0x3f   :  { %381 = vmatpush.msrb.mxu3 %v328_v13  ;;  %360 = vmatpush.msrb.mxu2 %v298_v20 }
  0x40   :  { %243 = vmatpush.msrb.mxu0 %v124_v23  ;;  %263 = vmatpush.msrb.mxu1 %v156_v24  ;;  %v325_v23 = vld [vmem:[#allocation2 + $0x458] sm:$0xff]  ;;  %v296_v24 = vld [vmem:[#allocation2 + $0x370] sm:$0xff] }
  0x41   :  { %382 = vmatpush.msrb.mxu3 %v326_v17  ;;  %361 = vmatpush.msrb.mxu2 %v296_v24 }
  0x42   :  { %244 = vmatpush.msrb.mxu0 %v122_v27  ;;  %264 = vmatpush.msrb.mxu1 %v154_v28  ;;  %v323_v27 = vld [vmem:[#allocation2 + $0x448] sm:$0xff]  ;;  %v294_v28 = vld [vmem:[#allocation2 + $0x360] sm:$0xff] }
  0x43   :  { %383 = vmatpush.msrb.mxu3 %v324_v21  ;;  %362 = vmatpush.msrb.mxu2 %v294_v28 }
  0x44   :  { %245 = vmatpush.msrb.mxu0 %v120_v31  ;;  %265 = vmatpush.msrb.mxu1 %v152_v32  ;;  %v321_v31 = vld [vmem:[#allocation2 + $0x438] sm:$0xff]  ;;  %v292_v32 = vld [vmem:[#allocation2 + $0x350] sm:$0xff] }
  0x45   :  { %384 = vmatpush.msrb.mxu3 %v322_v25  ;;  %363 = vmatpush.msrb.mxu2 %v292_v32 }
  0x46   :  { %413 = vmatpush.msra.mxu1 %v345_v34  ;;  %393 = vmatpush.msra.mxu0 %v313_v40  ;;  %v293_v34 = vld [vmem:[#allocation2 + $0x358] sm:$0xff]  ;;  %v288_v40 = vld [vmem:[#allocation2 + $0x330] sm:$0xff] }
  0x47   :  { %385 = vmatpush.msrb.mxu3 %v320_v29 }
  0x48   :  { %414 = vmatpush.msra.mxu1 %v343_v36  ;;  %394 = vmatpush.msra.mxu0 %v311_v44  ;;  %v290_v36 = vld [vmem:[#allocation2 + $0x340] sm:$0xff] }
  0x49   :  { %386 = vmatpush.msrb.mxu3 %v318_v33  ;;  %364 = vmatpush.msrb.mxu2 %v290_v36  ;;  %v286_v44 = vld [vmem:[#allocation2 + $0x320] sm:$0xff] }
  0x4a   :  { %415 = vmatpush.msra.mxu1 %v341_v38  ;;  %395 = vmatpush.msra.mxu0 %v309_v46  ;;  %v291_v38 = vld [vmem:[#allocation2 + $0x348] sm:$0xff]  ;;  %v284_v46 = vld [vmem:[#allocation2 + $0x310] sm:$0xff] }
  0x4b   :  { %387 = vmatpush.msrb.mxu3 %v316_v37  ;;  %365 = vmatpush.msrb.mxu2 %v288_v40 }
  0x4c   :  { %416 = vmatpush.msra.mxu1 %v339_v43  ;;  %396 = vmatpush.msra.mxu0 %v307_v6  ;;  %v315_v43 = vld [vmem:[#allocation2 + $0x408] sm:$0xff] }
  0x4d   :  { %388 = vmatpush.msrb.mxu3 %v314_v41  ;;  %366 = vmatpush.msrb.mxu2 %v286_v44 }
  0x4e   :  { %417 = vmatpush.msra.mxu1 %v337_v48  ;;  %397 = vmatpush.msra.mxu0 %v305_v10  ;;  %v282_v48 = vld [vmem:[#allocation2 + $0x300] sm:$0xff] }
  0x4f   :  { %367 = vmatpush.msrb.mxu2 %v284_v46 }
  0x50   :  { %418 = vmatpush.msra.mxu1 %v335_v51  ;;  %398 = vmatpush.msra.mxu0 %v303_v14  ;;  %v187_v51 = vperm.slane %v184_v50, 1 }
  0x51   :  { %368 = vmatpush.msrb.mxu2 %v282_v48 }
  0x52   :  { %419 = vmatpush.msra.mxu1 %v333_v7  ;;  %399 = vmatpush.msra.mxu0 %v301_v18  ;;  %v347_v7 = vld [vmem:[#allocation2 + $0x520] ss:$8 sm:$0x3] }
  0x53   :  { %v350_v8 = vperm.slane %v347_v7, 1  ;;  %v349_v10 = vperm.slane %v347_v7, 0 }
  0x54   :  { %420 = vmatpush.msra.mxu1 %v331_v11  ;;  %400 = vmatpush.msra.mxu0 %v299_v22 }
  0x56   :  { %421 = vmatpush.msra.mxu1 %v329_v15  ;;  %401 = vmatpush.msra.mxu0 %v297_v26 }
  0x58   :  { %422 = vmatpush.msra.mxu1 %v327_v19  ;;  %402 = vmatpush.msra.mxu0 %v295_v30 }
  0x5a   :  { %423 = vmatpush.msra.mxu1 %v325_v23  ;;  %403 = vmatpush.msra.mxu0 %v293_v34 }
  0x5c   :  { %424 = vmatpush.msra.mxu1 %v323_v27  ;;  %404 = vmatpush.msra.mxu0 %v291_v38 }
  0x5e   :  { %425 = vmatpush.msra.mxu1 %v321_v31  ;;  %405 = vmatpush.msra.mxu0 %v289_v42 }
  0x60   :  { %426 = vmatpush.msra.mxu1 %v319_v35  ;;  %406 = vmatpush.msra.mxu0 %v287_v45 }
  0x62   :  { %427 = vmatpush.msra.mxu1 %v317_v39  ;;  %407 = vmatpush.msra.mxu0 %v285_v47 }
  0x64   :  { %428 = vmatpush.msra.mxu1 %v315_v43  ;;  %408 = vmatpush.msra.mxu0 %v283_v49 }
  0xa2   :  { %v84_v54 = vpop.f32.mrf.mxu0  ;;  %v104_v55 = vpop.f32.mrf.mxu1 }
  0xa3   :  { %v85_v56 = vadd.f32 %v84_v54, %v63_v52  ;;  %v105_v57 = vadd.f32 %v104_v55, %v64_v53 }
  0xa5   :  { %v109_v58 = vmin.f32 %v85_v56, 0.0  ;;  %v110_v59 = vmin.f32 %v105_v57, 0.0  ;;  %vm107_vm0 = vcmp.gt.f32.partialorder %v85_v56, 0.0  ;;  %vm108_vm1 = vcmp.gt.f32.partialorder %v105_v57, 0.0 }
  0xa7   :  { %v111_v60 = vmul.f32 1.442695, %v109_v58  ;;  %v113_v61 = vmul.f32 1.442695, %v110_v59 }
  0xa9   :  { %464 = vpow2.f32 %v111_v60 }
  0xaa   :  { %466 = vpow2.f32 %v113_v61 }
  0xaf   :  { %v465_v62 = vpop.eup %464 }
  0xb0   :  { %v467_v63 = vpop.eup %466  ;;  %v457_v0 = vadd.f32 -1.0, %v465_v62 }
  0xb1   :  { %v458_v1 = vadd.f32 -1.0, %v467_v63 }
  0xb2   :  { %v117_v2 = vsel %vm107_vm0, %v85_v56, %v457_v0  ;;  %v186_v56 = vperm.slane %v184_v50, 0 }
  0xb3   :  { %206 = vmatmul.f32.vlgmr.msra.gmra.mxu2 %v117_v2  ;;  %v118_v3 = vsel %vm108_vm1, %v105_v57, %v458_v1  ;;  %246 = vmatmul.f32.vlgmr.msrb.gmra.mxu0 %v117_v2 }
  0xb4   :  { %226 = vmatmul.f32.vlgmr.msra.gmra.mxu3 %v118_v3  ;;  %266 = vmatmul.f32.vlgmr.msrb.gmra.mxu1 %v118_v3 }
 0x130   :  { %v247_v52 = vpop.f32.mrf.mxu0 }
 0x131   :  { %v248_v53 = vadd.f32 %v247_v52, %v187_v51  ;;  %v267_v54 = vpop.f32.mrf.mxu1 }
 0x133   :  { %v268_v55 = vadd.f32 %v267_v54, %v248_v53 }
 0x135   :  { %v273_v57 = vmin.f32 %v268_v55, 0.0  ;;  %vm271_vm2 = vcmp.gt.f32.partialorder %v268_v55, 0.0 }
 0x136   :  { %v207_v58 = vpop.f32.mrf.mxu2 }
 0x137   :  { %v276_v59 = vmul.f32 1.442695, %v273_v57  ;;  %v208_v60 = vadd.f32 %v207_v58, %v186_v56  ;;  %v227_v61 = vpop.f32.mrf.mxu3 }
 0x139   :  { %468 = vpow2.f32 %v276_v59  ;;  %v228_v62 = vadd.f32 %v227_v61, %v208_v60 }
 0x13b   :  { %v272_v63 = vmin.f32 %v228_v62, 0.0  ;;  %vm270_vm3 = vcmp.gt.f32.partialorder %v228_v62, 0.0 }
 0x13d   :  { %v274_v0 = vmul.f32 1.442695, %v272_v63 }
 0x13f   :  { %v469_v1 = vpop.eup %468  ;;  %470 = vpow2.f32 %v274_v0 }
 0x140   :  { %v460_v2 = vadd.f32 -1.0, %v469_v1 }
 0x142   :  { %v281_v3 = vsel %vm271_vm2, %v268_v55, %v460_v2 }
 0x143   :  { %389 = vmatmul.f32.vlgmr.msrb.gmra.mxu3 %v281_v3  ;;  %429 = vmatmul.f32.vlgmr.msra.gmra.mxu1 %v281_v3 }
 0x145   :  { %v471_v4 = vpop.eup %470 }
 0x146   :  { %v459_v5 = vadd.f32 -1.0, %v471_v4 }
 0x148   :  { %v280_v6 = vsel %vm270_vm3, %v228_v62, %v459_v5 }
 0x149   :  { %369 = vmatmul.f32.vlgmr.msrb.gmra.mxu2 %v280_v6  ;;  %409 = vmatmul.f32.vlgmr.msra.gmra.mxu0 %v280_v6 }
 0x1c0   :  { %v430_v14 = vpop.f32.mrf.mxu1 }
 0x1c6   :  { %v410_v9 = vpop.f32.mrf.mxu0  ;;  %v390_v15 = vpop.f32.mrf.mxu3 }
 0x1c7   :  { %v411_v11 = vadd.f32 %v410_v9, %v350_v8 }
 0x1c9   :  { %v431_v16 = vadd.f32 %v430_v14, %v411_v11 }
 0x1cc   :  { %v370_v12 = vpop.f32.mrf.mxu2 }
 0x1cd   :  { %v371_v13 = vadd.f32 %v370_v12, %v349_v10 }
 0x1cf   :  { %v391_v17 = vadd.f32 %v390_v15, %v371_v13 }
 0x1d1   :  { %v433_v18 = vmax.f32 %v391_v17, %v431_v16 }
 0x1d3   :  { %434 = vmax.xlane.f32.xlu0 %v433_v18 }
 0x246   :  { %v435_v19 = vpop.xlane.xlu0 %434 }
 0x247   :  { %v436_v20 = vsub.f32 %v391_v17, %v435_v19  ;;  %v437_v21 = vsub.f32 %v431_v16, %v435_v19 }
 0x249   :  { %v438_v22 = vmul.f32 1.442695, %v436_v20  ;;  %v440_v23 = vmul.f32 1.442695, %v437_v21 }
 0x24b   :  { %472 = vpow2.f32 %v438_v22 }
 0x24c   :  { %474 = vpow2.f32 %v440_v23 }
 0x251   :  { %v473_v24 = vpop.eup %472 }
 0x252   :  { %v475_v25 = vpop.eup %474 }
 0x253   :  { %v442_v26 = vadd.f32 %v475_v25, %v473_v24 }
 0x255   :  { %443 = vadd.xlane.f32.xlu0 %v442_v26 }
 0x2c8   :  { %v444_v27 = vpop.xlane.xlu0 %443 }
 0x2c9   :  { %476 = vlog2.f32 %v444_v27 }
 0x2cf   :  { %v477_v28 = vpop.eup %476 }
 0x2d0   :  { %v446_v29 = vmul.f32 0.6931472, %v477_v28 }
 0x2d2   :  { %v447_v30 = vadd.f32 %v446_v29, %v435_v19 }
 0x2d4   :  { %v448_v31 = vsub.f32 %v391_v17, %v447_v30  ;;  %v449_v32 = vsub.f32 %v431_v16, %v447_v30 }
 0x2d6   :  { %450 = vst [vmem:[%s536_s2] sm:$0xff] %v448_v31 }
 0x2d7   :  { %451 = vst [vmem:[%s536_s2 + $0x8] sm:$0xff] %v449_v32 }
 0x2d8   :  { %456 = vsyncpa [#allocation3], 1 }

</bundles_post_ra>
